<compile_context>
chip_gen: v6e
topology: v6e:2x2x1
jax: 0.10.0
libtpu: 0.0.40
codegen_flags: <defaults>
</compile_context>

<pallas_src>
import math

import jax
import jax.numpy as jnp
from jax import lax
from jax.experimental import pallas as pl
from jax.experimental.pallas import tpu as pltpu

EPS = 1e-5
LANES = 128
SUBLANES = 8
TARGET_BLOCK_BYTES = 2 << 20   # ~2 MiB x-block: near HBM roofline, VMEM-safe on v7x
MAX_LANE_TILE = 2048


def _bn_affine_kernel(scale_ref, shift_ref, x_ref, o_ref):
    # scale/shift blocks are (br, 1) columns; broadcast across the 128-lane dim.
    o_ref[...] = x_ref[...] * scale_ref[...] + shift_ref[...]


def native_batch_norm_eval(x, bias, running_mean, running_var, *, eps=EPS):
    """aten.native_batch_norm(x, None, bias, running_mean, running_var,
    training=False, eps): returns the normalized output (weight/gamma == 1).

    x: (N, C, *spatial) float32; bias / running_mean / running_var: (C,) float32.
    """
    orig_shape = x.shape
    N, C = orig_shape[0], orig_shape[1]
    spatial = math.prod(orig_shape[2:]) if len(orig_shape) > 2 else 1
    rows = N * C

    # weight is None -> gamma = 1. Fold BN into a single per-channel affine.
    scale = lax.rsqrt(running_var.astype(jnp.float32) + eps)                 # (C,)
    shift = bias.astype(jnp.float32) - running_mean.astype(jnp.float32) * scale

    # Zero-copy (N*C, spatial) view of x + tiny per-row parameter columns.
    x2 = x.reshape(rows, spatial).astype(jnp.float32)
    scale_col = jnp.broadcast_to(scale[None, :], (N, C)).reshape(rows, 1)
    shift_col = jnp.broadcast_to(shift[None, :], (N, C)).reshape(rows, 1)

    # ---- tile selection ----------------------------------------------------
    # Lane tile: a multiple of 128 (<= spatial), or the full (small) spatial dim.
    if spatial >= LANES:
        bc = min((spatial // LANES) * LANES, MAX_LANE_TILE)
    else:
        bc = spatial                      # full-dim block (masked stores; tiny tensor)

    # Row tile: a multiple of 8 (or the full row dim), sized toward ~2 MiB blocks.
    if rows >= SUBLANES:
        cap_rows = max(SUBLANES, TARGET_BLOCK_BYTES // (bc * 4))
        br = max(SUBLANES, min((rows // SUBLANES) * SUBLANES,
                               (cap_rows // SUBLANES) * SUBLANES))
    else:
        br = rows                         # full-dim block

    grid = (pl.cdiv(rows, br), pl.cdiv(spatial, bc))
    # v7x has 2 TensorCores: prefer >= 2 grid steps when the tensor allows it.
    if grid[0] * grid[1] < 2 and rows >= 2 * SUBLANES:
        br = max(SUBLANES, ((rows // 2) // SUBLANES) * SUBLANES)
        grid = (pl.cdiv(rows, br), pl.cdiv(spatial, bc))

    total = rows * spatial
    cost = pl.CostEstimate(flops=2 * total, transcendentals=0,
                           bytes_accessed=(2 * total + 2 * rows) * 4)

    out2 = pl.pallas_call(
        _bn_affine_kernel,
        out_shape=jax.ShapeDtypeStruct((rows, spatial), jnp.float32),
        grid_spec=pltpu.PrefetchScalarGridSpec(
            num_scalar_prefetch=0,
            grid=grid,
            in_specs=[
                pl.BlockSpec((br, 1), lambda i, j: (i, 0)),    # scale column
                pl.BlockSpec((br, 1), lambda i, j: (i, 0)),    # shift column
                pl.BlockSpec((br, bc), lambda i, j: (i, j)),   # x tile
            ],
            out_specs=pl.BlockSpec((br, bc), lambda i, j: (i, j)),
        ),
        compiler_params=pltpu.CompilerParams(
            dimension_semantics=("parallel", "parallel")),
        cost_estimate=cost,
    )(scale_col, shift_col, x2)

    out = out2.reshape(orig_shape)
    # TODO(synk): aten.native_batch_norm also returns (save_mean, save_invstd);
    # they are empty tensors in eval mode, so only the normalized output is produced.
    return out


if __name__ == "__main__":
    key = jax.random.PRNGKey(0)

    def reference(x, bias, mean, var, eps=EPS):
        bshape = (1, x.shape[1]) + (1,) * (x.ndim - 2)
        return (x - mean.reshape(bshape)) * lax.rsqrt(var.reshape(bshape) + eps) \
            + bias.reshape(bshape)

    bn = jax.jit(native_batch_norm_eval)

    # Two 5-D shapes per the module annotation ([-1]*5):
    #   (2,4,4,8,8): spatial = 256 -> lane-aligned, zero-copy, unmasked stores.
    #   (2,5,2,3,7): spatial = 42  -> ragged path, masked boundary blocks.
    shapes = [(2, 4, 4, 8, 8), (2, 5, 2, 3, 7)]
    for shp in shapes:
        key, kx, kb, km, kv = jax.random.split(key, 5)
        C = shp[1]
        x = jax.random.normal(kx, shp, dtype=jnp.float32)
        bias = jax.random.normal(kb, (C,), dtype=jnp.float32)
        running_mean = jax.random.normal(km, (C,), dtype=jnp.float32)
        running_var = jax.random.uniform(kv, (C,), dtype=jnp.float32,
                                         minval=0.5, maxval=1.5)

        out = jax.block_until_ready(bn(x, bias, running_mean, running_var))
        ref = reference(x, bias, running_mean, running_var)

        assert out.shape == x.shape
        assert jnp.allclose(out, ref, atol=1e-5, rtol=1e-5), float(
            jnp.max(jnp.abs(out - ref)))

    print("KERNEL_OK")
</pallas_src>

<mosaic_0001>
module attributes {stable_mosaic.version = 11 : i64} {
  func.func @_bn_affine_kernel(%arg0: i32, %arg1: i32, %arg2: memref<8x1xf32, #tpu.memory_space<vmem>>, %arg3: memref<8x1xf32, #tpu.memory_space<vmem>>, %arg4: memref<8x256xf32, #tpu.memory_space<vmem>>, %arg5: memref<8x256xf32, #tpu.memory_space<vmem>>) attributes {dimension_semantics = [#tpu.dimension_semantics<parallel>, #tpu.dimension_semantics<parallel>], iteration_bounds = array<i64: 1, 1>, scalar_prefetch = 0 : i64, scratch_operands = 0 : i64, tpu.core_type = #tpu.core_type<tc>, window_params = [{transform_indices = @transform_0, window_bounds = array<i64: 8, 1>}, {transform_indices = @transform_1, window_bounds = array<i64: 8, 1>}, {transform_indices = @transform_2, window_bounds = array<i64: 8, 256>}, {transform_indices = @transform_3, window_bounds = array<i64: 8, 256>}]} {
    %c0 = arith.constant 0 : index
    %c0_0 = arith.constant 0 : index
    %0 = vector.load %arg4[%c0, %c0_0] : memref<8x256xf32, #tpu.memory_space<vmem>>, vector<8x256xf32>
    %c0_1 = arith.constant 0 : index
    %c0_2 = arith.constant 0 : index
    %1 = vector.load %arg2[%c0_1, %c0_2] : memref<8x1xf32, #tpu.memory_space<vmem>>, vector<8x1xf32>
    %2 = vector.broadcast %1 : vector<8x1xf32> to vector<8x256xf32>
    %3 = arith.mulf %0, %2 : vector<8x256xf32>
    %c0_3 = arith.constant 0 : index
    %c0_4 = arith.constant 0 : index
    %4 = vector.load %arg3[%c0_3, %c0_4] : memref<8x1xf32, #tpu.memory_space<vmem>>, vector<8x1xf32>
    %5 = vector.broadcast %4 : vector<8x1xf32> to vector<8x256xf32>
    %6 = arith.addf %3, %5 : vector<8x256xf32>
    %c0_5 = arith.constant 0 : index
    %c0_6 = arith.constant 0 : index
    %7 = vector.load %arg5[%c0_5, %c0_6] : memref<8x256xf32, #tpu.memory_space<vmem>>, vector<8x256xf32>
    tpu.vector_store %arg5[%c0_5, %c0_6], %6 {strides = array<i32>} : memref<8x256xf32, #tpu.memory_space<vmem>>, vector<8x256xf32>,
    return
  }
  func.func @transform_0(%arg0: i32, %arg1: i32) -> (i32, i32) {
    %c0_i32 = arith.constant 0 : i32
    %c0_i32_0 = arith.constant 0 : i32
    return %arg0, %c0_i32 : i32, i32
  }
  func.func @transform_1(%arg0: i32, %arg1: i32) -> (i32, i32) {
    %c0_i32 = arith.constant 0 : i32
    %c0_i32_0 = arith.constant 0 : i32
    return %arg0, %c0_i32 : i32, i32
  }
  func.func @transform_2(%arg0: i32, %arg1: i32) -> (i32, i32) {
    %c0_i32 = arith.constant 0 : i32
    return %arg0, %arg1 : i32, i32
  }
  func.func @transform_3(%arg0: i32, %arg1: i32) -> (i32, i32) {
    %c0_i32 = arith.constant 0 : i32
    return %arg0, %arg1 : i32, i32
  }
}

</mosaic_0001>

<bundles_post_ra>
// kernel: native_batch_norm_eval.1
= control target key start
LH: loop header
LB: loop body
LE: loop exit
PB: predicated region body
PF: predicated region fallthrough
CT: control target
= control target key end

     0   :  { %v40_v0 = vmov 0   ;;  %s79_s0 = inlined_call_operand.vmem [shape: f32[8,1], index: 0, kind: input, shape index: {}]   ;;  %s80_s1 = inlined_call_operand.vmem [shape: f32[8,1], index: 1, kind: input, shape index: {}]   ;;  %s81_s2 = inlined_call_operand.vmem [shape: f32[8,256], index: 2, kind: input, shape index: {}]   ;;  %s82_s3 = inlined_call_operand.vmem [shape: f32[8,256], index: 3, kind: output, shape index: {}]  }
   0x1   :  { %39 = vset.pattern.permute.xlu0 %v40_v0  ;;  %v16_v1 = vld [vmem:[%s79_s0] sm:$0xff]  ;;  %v15_v4 = vld [vmem:[%s81_s2 + $0x8] sm:$0xff] }
   0x2   :  { %19 = vperm.xlu0 %39, %v16_v1   ;;  %v24_v2 = vld [vmem:[%s80_s1] sm:$0xff] }
   0x3   :  { %v14_v3 = vld [vmem:[%s81_s2] sm:$0xff] }
   0x6   :  { %27 = vperm.xlu0 %39, %v24_v2  }
  0x7d   :  { %v20_v5 = vpop.permute.xlu0 %19 }
  0x7e   :  { %v22_v6 = vmul.f32 %v20_v5, %v14_v3  ;;  %v23_v7 = vmul.f32 %v20_v5, %v15_v4 }
  0x81   :  { %v28_v8 = vpop.permute.xlu0 %27 }
  0x82   :  { %v30_v9 = vadd.f32 %v28_v8, %v22_v6  ;;  %v31_v10 = vadd.f32 %v28_v8, %v23_v7 }
  0x84   :  { %32 = vst [vmem:[%s82_s3] sm:$0xff] %v30_v9  ;;  %33 = vst [vmem:[%s82_s3 + $0x8] sm:$0xff] %v31_v10 }

</bundles_post_ra>
